<compile_context>
chip_gen: v6e
topology: v6e:2x2x1
jax: 0.10.0
libtpu: 0.0.40
codegen_flags: <defaults>
</compile_context>

<pallas_src>
import functools

import jax
import jax.numpy as jnp
from jax import lax
from jax.experimental import pallas as pl
from jax.experimental.pallas import tpu as pltpu


# ----------------------------- Pallas kernel -----------------------------
def _primary_caps_kernel(x_ref, w_ref, b_ref, o_ref, *, kh, stride, ho, bt):
    # x_ref: (Bt, H, W*C_in)      bf16  lane-fused input rows
    # w_ref: (KH, W*C_in, L_pad)  bf16  block-Toeplitz weights (resident)
    # b_ref: (1, L_pad)           f32   bias per (ow, unit, c_out) column
    # o_ref: (Bt, Ho, L_pad)      bf16  lane-dense output block
    bias = b_ref[...]
    w = [w_ref[i] for i in range(kh)]          # hoisted (W*C_in, L_pad) slabs
    for b in range(bt):                        # bt is small & static
        xb = x_ref[b]                          # (H, W*C_in) bf16
        acc = None
        for i in range(kh):
            # rows oh*stride + i for oh = 0..Ho-1 (dense for stride == 1)
            xi = xb[i:i + (ho - 1) * stride + 1:stride, :]     # (Ho, W*C_in)
            d = jnp.dot(xi, w[i], preferred_element_type=jnp.float32)
            acc = d if acc is None else acc + d
        o_ref[b] = (acc + bias).astype(o_ref.dtype)


# ------------------------------- wrapper ----------------------------------
@functools.partial(jax.jit, static_argnames=("kh", "kw", "stride", "block_b"))
def primary_capsules_forward(x, weights, biases, *, kh, kw, stride, block_b=8):
    """x: (B, C_in, H, W) NCHW.  weights: (U, C_out, C_in, KH, KW).
    biases: (U, C_out).  Returns (B, U, Ho, Wo, C_out), i.e. torch's
    out.permute(1, 0, -2, -1, -3)."""
    # TODO(synk): only stride + padding=0 (VALID) Conv2d kwargs are supported;
    # padding>0 / dilation / groups are not implemented.
    B, C_in, H, W = x.shape
    U, C_out = weights.shape[0], weights.shape[1]
    Ho = (H - kh) // stride + 1
    Wo = (W - kw) // stride + 1
    N = U * C_out
    K = W * C_in                        # GEMM contraction = one fused image row
    L = Wo * N                          # lane-fused output row (ow, unit, co)
    L_pad = ((L + 127) // 128) * 128    # lane-dense, unmasked stores

    # Lane-fused NHWC input, bf16: (B, H, W*C_in).
    x_f = jnp.transpose(x, (0, 2, 3, 1)).reshape(B, H, K).astype(jnp.bfloat16)

    # Batch blocking: Bt images per grid step, grid kept >= 2 when B > 1.
    bt = max(1, min(block_b, B))
    if B > 1 and -(-B // bt) < 2:
        bt = -(-B // 2)
    nb = -(-B // bt)
    B_pad = nb * bt
    if B_pad != B:
        x_f = jnp.pad(x_f, ((0, B_pad - B), (0, 0), (0, 0)))

    # Block-Toeplitz weights: fold the (KW, C_in) gather into the GEMM.
    # w_t[i, j, c, n] = weights[u, co, c, i, j],  n = u*C_out + co
    w_t = jnp.transpose(weights, (3, 4, 2, 0, 1)).reshape(kh, kw, C_in, N)
    j_idx = jnp.arange(W)[:, None] - jnp.arange(Wo)[None, :] * stride  # (W, Wo)
    valid = (j_idx >= 0) & (j_idx < kw)
    j_cl = jnp.clip(j_idx, 0, kw - 1)
    w_toe = w_t[:, j_cl, :, :]                               # (kh, W, Wo, C, N)
    w_toe = jnp.where(valid[None, :, :, None, None], w_toe, 0.0)
    w_toe = jnp.transpose(w_toe, (0, 1, 3, 2, 4)).reshape(kh, K, L)
    w_toe = jnp.pad(w_toe, ((0, 0), (0, 0), (0, L_pad - L))).astype(jnp.bfloat16)

    b_row = jnp.tile(biases.reshape(N).astype(jnp.float32), Wo)       # (Wo*N,)
    b_row = jnp.pad(b_row, (0, L_pad - L)).reshape(1, L_pad)

    kernel = functools.partial(_primary_caps_kernel, kh=kh, stride=stride,
                               ho=Ho, bt=bt)

    # Honest cost estimate: true conv FLOPs, real bytes moved.
    flops = 2 * B * Ho * Wo * N * C_in * kh * kw
    bytes_accessed = (x_f.size * 2 + w_toe.size * 2 + b_row.size * 4
                      + B * Ho * Wo * N * 2)

    out3 = pl.pallas_call(
        kernel,
        out_shape=jax.ShapeDtypeStruct((B_pad, Ho, L_pad), jnp.bfloat16),
        grid=(nb,),
        in_specs=[
            pl.BlockSpec((bt, H, K), lambda b: (b, 0, 0)),       # Bt images
            pl.BlockSpec((kh, K, L_pad), lambda b: (0, 0, 0)),   # resident
            pl.BlockSpec((1, L_pad), lambda b: (0, 0)),          # resident
        ],
        out_specs=pl.BlockSpec((bt, Ho, L_pad), lambda b: (b, 0, 0)),
        compiler_params=pltpu.CompilerParams(
            dimension_semantics=("parallel",)),
        cost_estimate=pl.CostEstimate(flops=flops, transcendentals=0,
                                      bytes_accessed=bytes_accessed),
    )(x_f, w_toe, b_row)

    # Single fused epilogue: drop batch/lane padding, split (ow, U, C_out) and
    # permute to torch's (B, U, Ho, Wo, C_out) layout.
    out = out3[:B, :, :L].reshape(B, Ho, Wo, U, C_out)
    return jnp.transpose(out, (0, 3, 1, 2, 4)).astype(jnp.float32)


# ------------------------- reference (pure JAX) ---------------------------
def primary_capsules_ref(x, weights, biases, *, stride):
    U = weights.shape[0]
    per_unit = []
    for u in range(U):
        y = lax.conv_general_dilated(
            x, weights[u], window_strides=(stride, stride), padding="VALID",
            dimension_numbers=("NCHW", "OIHW", "NCHW"))
        y = y + biases[u][None, :, None, None]
        per_unit.append(y)
    out = jnp.stack(per_unit, axis=0)            # (U, B, C_out, Ho, Wo)
    return out.transpose(1, 0, 3, 4, 2)          # == permute(1, 0, -2, -1, -3)


if __name__ == "__main__":
    # 8 conv units of nn.Conv2d(in_channels=4, out_channels=8, kernel_size=3,
    # stride=1, padding=0).
    B, C_in, H, W = 2, 4, 16, 16
    U, C_out, KH, KW, STRIDE = 8, 8, 3, 3, 1

    key = jax.random.PRNGKey(0)
    kx, kw_, kb = jax.random.split(key, 3)
    x = jax.random.normal(kx, (B, C_in, H, W), dtype=jnp.float32)
    fan_in = C_in * KH * KW
    weights = jax.random.normal(kw_, (U, C_out, C_in, KH, KW),
                                dtype=jnp.float32) * (1.0 / fan_in ** 0.5)
    biases = jax.random.normal(kb, (U, C_out), dtype=jnp.float32) * 0.1

    out = primary_capsules_forward(x, weights, biases, kh=KH, kw=KW,
                                   stride=STRIDE)
    out = jax.block_until_ready(out)
    assert out.shape == (B, U, H - KH + 1, W - KW + 1, C_out), out.shape

    # Tight check: f32 reference fed the same bf16-rounded operands (kernel
    # accumulates in f32; remaining diff is the bf16 output store rounding).
    xq = x.astype(jnp.bfloat16).astype(jnp.float32)
    wq = weights.astype(jnp.bfloat16).astype(jnp.float32)
    ref_q = primary_capsules_ref(xq, wq, biases, stride=STRIDE)
    assert jnp.allclose(out, ref_q, atol=2e-2, rtol=1e-2), \
        "mismatch vs bf16-rounded reference"

    # Loose check: full-f32 reference (difference = bf16 quantization).
    ref = primary_capsules_ref(x, weights, biases, stride=STRIDE)
    assert jnp.allclose(out, ref, atol=6e-2, rtol=6e-2), \
        "mismatch vs f32 reference"

    print("KERNEL_OK")
</pallas_src>

<mosaic_0001>
module attributes {stable_mosaic.version = 11 : i64} {
  func.func @_primary_caps_kernel(%arg0: i32, %arg1: memref<1x16x64xbf16, #tpu.memory_space<vmem>>, %arg2: memref<3x64x896xbf16, #tpu.memory_space<vmem>>, %arg3: memref<1x896xf32, #tpu.memory_space<vmem>>, %arg4: memref<1x14x896xbf16, #tpu.memory_space<vmem>>) attributes {dimension_semantics = [#tpu.dimension_semantics<parallel>], iteration_bounds = array<i64: 2>, scalar_prefetch = 0 : i64, scratch_operands = 0 : i64, tpu.core_type = #tpu.core_type<tc>, window_params = [{transform_indices = @transform_0, window_bounds = array<i64: 1, 16, 64>}, {pipeline_mode = #tpu.pipeline_mode<synchronous>, transform_indices = @transform_1, window_bounds = array<i64: 3, 64, 896>}, {pipeline_mode = #tpu.pipeline_mode<synchronous>, transform_indices = @transform_2, window_bounds = array<i64: 1, 896>}, {transform_indices = @transform_3, window_bounds = array<i64: 1, 14, 896>}]} {
    %c0 = arith.constant 0 : index
    %c0_0 = arith.constant 0 : index
    %0 = vector.load %arg3[%c0, %c0_0] : memref<1x896xf32, #tpu.memory_space<vmem>>, vector<1x896xf32>
    %c0_1 = arith.constant 0 : index
    %c0_2 = arith.constant 0 : index
    %c0_3 = arith.constant 0 : index
    %1 = vector.load %arg2[%c0_1, %c0_2, %c0_3] : memref<3x64x896xbf16, #tpu.memory_space<vmem>>, vector<1x64x896xbf16>
    %2 = vector.shape_cast %1 : vector<1x64x896xbf16> to vector<64x896xbf16>
    %c1 = arith.constant 1 : index
    %c0_4 = arith.constant 0 : index
    %c0_5 = arith.constant 0 : index
    %3 = vector.load %arg2[%c1, %c0_4, %c0_5] : memref<3x64x896xbf16, #tpu.memory_space<vmem>>, vector<1x64x896xbf16>
    %4 = vector.shape_cast %3 : vector<1x64x896xbf16> to vector<64x896xbf16>
    %c2 = arith.constant 2 : index
    %c0_6 = arith.constant 0 : index
    %c0_7 = arith.constant 0 : index
    %5 = vector.load %arg2[%c2, %c0_6, %c0_7] : memref<3x64x896xbf16, #tpu.memory_space<vmem>>, vector<1x64x896xbf16>
    %6 = vector.shape_cast %5 : vector<1x64x896xbf16> to vector<64x896xbf16>
    %c0_8 = arith.constant 0 : index
    %c0_9 = arith.constant 0 : index
    %c0_10 = arith.constant 0 : index
    %7 = vector.load %arg1[%c0_8, %c0_9, %c0_10] : memref<1x16x64xbf16, #tpu.memory_space<vmem>>, vector<1x16x64xbf16>
    %8 = vector.shape_cast %7 : vector<1x16x64xbf16> to vector<16x64xbf16>
    %9 = vector.extract_strided_slice %8 {offsets = [0, 0], sizes = [14, 64], strides = [1, 1]} : vector<16x64xbf16> to vector<14x64xbf16>
    %cst = arith.constant dense<0.000000e+00> : vector<14x896xf32>
    %10 = tpu.matmul %9, %2, %cst {dimension_numbers = #tpu.dot_dimension_numbers<[1], [0], [0], [1], [0, 0, 1, 1], [], []>} : vector<14x64xbf16>, vector<64x896xbf16>, vector<14x896xf32> -> vector<14x896xf32>
    %11 = vector.extract_strided_slice %8 {offsets = [1, 0], sizes = [14, 64], strides = [1, 1]} : vector<16x64xbf16> to vector<14x64xbf16>
    %cst_11 = arith.constant dense<0.000000e+00> : vector<14x896xf32>
    %12 = tpu.matmul %11, %4, %cst_11 {dimension_numbers = #tpu.dot_dimension_numbers<[1], [0], [0], [1], [0, 0, 1, 1], [], []>} : vector<14x64xbf16>, vector<64x896xbf16>, vector<14x896xf32> -> vector<14x896xf32>
    %13 = arith.addf %10, %12 : vector<14x896xf32>
    %14 = vector.extract_strided_slice %8 {offsets = [2, 0], sizes = [14, 64], strides = [1, 1]} : vector<16x64xbf16> to vector<14x64xbf16>
    %cst_12 = arith.constant dense<0.000000e+00> : vector<14x896xf32>
    %15 = tpu.matmul %14, %6, %cst_12 {dimension_numbers = #tpu.dot_dimension_numbers<[1], [0], [0], [1], [0, 0, 1, 1], [], []>} : vector<14x64xbf16>, vector<64x896xbf16>, vector<14x896xf32> -> vector<14x896xf32>
    %16 = arith.addf %13, %15 : vector<14x896xf32>
    %17 = vector.broadcast %0 : vector<1x896xf32> to vector<14x896xf32>
    %18 = arith.addf %16, %17 : vector<14x896xf32>
    %19 = arith.truncf %18 : vector<14x896xf32> to vector<14x896xbf16>
    %c0_13 = arith.constant 0 : index
    %c0_14 = arith.constant 0 : index
    %c0_15 = arith.constant 0 : index
    %20 = vector.load %arg4[%c0_13, %c0_14, %c0_15] : memref<1x14x896xbf16, #tpu.memory_space<vmem>>, vector<1x14x896xbf16>
    %21 = vector.shape_cast %20 : vector<1x14x896xbf16> to vector<14x896xbf16>
    %22 = vector.shape_cast %19 : vector<14x896xbf16> to vector<1x14x896xbf16>
    tpu.vector_store %arg4[%c0_13, %c0_14, %c0_15], %22 {strides = array<i32>} : memref<1x14x896xbf16, #tpu.memory_space<vmem>>, vector<1x14x896xbf16>,
    return
  }
  func.func @transform_0(%arg0: i32) -> (i32, i32, i32) {
    %c0_i32 = arith.constant 0 : i32
    %c0_i32_0 = arith.constant 0 : i32
    %c0_i32_1 = arith.constant 0 : i32
    return %arg0, %c0_i32, %c0_i32_0 : i32, i32, i32
  }
  func.func @transform_1(%arg0: i32) -> (i32, i32, i32) {
    %c0_i32 = arith.constant 0 : i32
    %c0_i32_0 = arith.constant 0 : i32
    %c0_i32_1 = arith.constant 0 : i32
    %c0_i32_2 = arith.constant 0 : i32
    return %c0_i32, %c0_i32_0, %c0_i32_1 : i32, i32, i32
  }
  func.func @transform_2(%arg0: i32) -> (i32, i32) {
    %c0_i32 = arith.constant 0 : i32
    %c0_i32_0 = arith.constant 0 : i32
    %c0_i32_1 = arith.constant 0 : i32
    return %c0_i32, %c0_i32_0 : i32, i32
  }
  func.func @transform_3(%arg0: i32) -> (i32, i32, i32) {
    %c0_i32 = arith.constant 0 : i32
    %c0_i32_0 = arith.constant 0 : i32
    %c0_i32_1 = arith.constant 0 : i32
    return %arg0, %c0_i32, %c0_i32_0 : i32, i32, i32
  }
}

</mosaic_0001>

<bundles_post_ra>
// kernel: tile.6
= control target key start
LH: loop header
LB: loop body
LE: loop exit
PB: predicated region body
PF: predicated region fallthrough
CT: control target
= control target key end

     0   :  { %s28_s0 = inlined_call_operand.vmem [shape: f32[64], index: 0, kind: input, shape index: {}]   ;;  %s29_s1 = inlined_call_operand.vmem [shape: f32[14,64], index: 1, kind: output, shape index: {}]  }
   0x1   :  { %v4_v0 = vld [vmem:[%s28_s0] ss:$0 sm:$0xff] }
   0x2   :  { %5 = vst [vmem:[%s29_s1] sm:$0xff] %v4_v0  ;;  %8 = vst [vmem:[%s29_s1 + $0x8] sm:$0xff] %v4_v0 }

// kernel: tile.5
= control target key start
LH: loop header
LB: loop body
LE: loop exit
PB: predicated region body
PF: predicated region fallthrough
CT: control target
= control target key end

     0   :  { %2 = vsyncpa [#allocation1], 0  ;;  %s96_s6 = smov [#allocation0]   ;;  %s120_s0 = inlined_call_operand.hbm [shape: f32[8,8], index: 0, kind: input, shape index: {}]   ;;  %s121_s1 = inlined_call_operand.vmem [shape: f32[64], index: 1, kind: output, shape index: {}]  }
   0x1   :  { %s7_s7 = sshll.u32 %s96_s6, 4  ;;  %s8_s7 = int_to_ptr.vmem [resolvable:$true] %s7_s7 }
   0x2   :  { %s82_s8 = scalar_lea.vmem %s8_s7, 128  ;;  %p87_p1 = scmp.lt.s32.totalorder %s8_s7, %s8_s7 }
   0x3   :  { %p83_p0 = scmp.ne.s32.totalorder %s8_s7, %s82_s8  ;;  %p88_p2 = scmp.lt.s32.totalorder %s82_s8, %s82_s8 }
   0x5   :  { %p89_p3 = por %p88_p2, %p87_p1 }
   0x7   :  { %p90_p4 = pnand %p89_p3, %p83_p0 }
   0x9   :  { %93 = shalt.err (!%p90_p4)
}
   0xa   :  { %10 = dma.hbm_to_vmem [thread:$0]  %s120_s0, 128, %s8_s7, [#allocation1]  }
   0xb   :  { %94 = dma.done.wait [#allocation1], 128  }
   0xc   :  { %95 = vsyncadd [#allocation1], 4294967168  ;;  %v16_v0 = vld [vmem:[#allocation0 + $0x7] sm:$0x1]   ;;  %v28_v1 = vld [vmem:[#allocation0 + $0x5] sm:$0x1]  }
   0xd   :  { %vm13_vm0 = vcmask 64512   ;;  %s97_s0 = smov 56   ;;  %s98_s11 = smov 40   ;;  %v22_v2 = vld [vmem:[#allocation0 + $0x6] sm:$0x1]   ;;  %vm19_vm1 = vcmask 523712  }
   0xe   :  { %17 = vrot.lane.b32.xlu0 %v16_v0, %s97_s0  ;;  %29 = vrot.lane.b32.xlu1 %v28_v1, %s98_s11  ;;  %v34_v3 = vld [vmem:[#allocation0 + $0x4] sm:$0x1]   ;;  %v12_v4 = vld [vmem:[#allocation0] sm:$0x1]   ;;  %s99_s12 = smov 48   ;;  %s100_s13 = smov 32  }
   0xf   :  { %14 = vst.msk [vmem:[#allocation2] sm:$0x1] %vm13_vm0, %v12_v4   ;;  %v40_v5 = vld [vmem:[#allocation0 + $0x3] sm:$0x1]   ;;  %v46_v6 = vld [vmem:[#allocation0 + $0x2] sm:$0x1]  }
  0x10   :  { %s101_s14 = smov 24   ;;  %s102_s15 = smov 16   ;;  %v52_v7 = vld [vmem:[#allocation0 + $0x1] sm:$0x1]   ;;  %vm25_vm2 = vcmask 458112   ;;  %vm31_vm3 = vcmask 392512  }
  0x11   :  { %s103_s16 = smov 8   ;;  %vm37_vm4 = vcmask 326912   ;;  %vm43_vm5 = vcmask 261312   ;;  %vm49_vm6 = vcmask 195712   ;;  %vm55_vm7 = vcmask 130112  }
  0x12   :  { %23 = vrot.lane.b32.xlu0 %v22_v2, %s99_s12  ;;  %35 = vrot.lane.b32.xlu1 %v34_v3, %s100_s13 }
  0x16   :  { %41 = vrot.lane.b32.xlu0 %v40_v5, %s101_s14  ;;  %47 = vrot.lane.b32.xlu1 %v46_v6, %s102_s15 }
  0x1a   :  { %53 = vrot.lane.b32.xlu0 %v52_v7, %s103_s16 }
  0x80   :  { %v18_v8 = vpop.permute.xlu0 %17   ;;  %v30_v9 = vpop.permute.xlu1 %29  }
  0x81   :  { %20 = vst.msk [vmem:[#allocation2] sm:$0x1] %vm19_vm1, %v18_v8  }
  0x84   :  { %v24_v10 = vpop.permute.xlu0 %23   ;;  %v36_v11 = vpop.permute.xlu1 %35  }
  0x85   :  { %26 = vst.msk [vmem:[#allocation2] sm:$0x1] %vm25_vm2, %v24_v10  }
  0x86   :  { %32 = vst.msk [vmem:[#allocation2] sm:$0x1] %vm31_vm3, %v30_v9  }
  0x87   :  { %38 = vst.msk [vmem:[#allocation2] sm:$0x1] %vm37_vm4, %v36_v11  }
  0x88   :  { %v42_v12 = vpop.permute.xlu0 %41   ;;  %v48_v13 = vpop.permute.xlu1 %47  }
  0x89   :  { %44 = vst.msk [vmem:[#allocation2] sm:$0x1] %vm43_vm5, %v42_v12  }
  0x8a   :  { %50 = vst.msk [vmem:[#allocation2] sm:$0x1] %vm49_vm6, %v48_v13  }
  0x8c   :  { %v54_v14 = vpop.permute.xlu0 %53  }
  0x8d   :  { %56 = vst.msk [vmem:[#allocation2] sm:$0x1] %vm55_vm7, %v54_v14  }
  0x94   :  { %v61_v15 = vld [vmem:[#allocation2] sm:$0x1] }
  0x95   :  { %64 = vst [vmem:[%s121_s1] sm:$0x1] %v61_v15 }
  0x96   :  { %65 = vsyncpa [#allocation1], 1 }

// kernel: primary_capsules_forward.1
= control target key start
LH: loop header
LB: loop body
LE: loop exit
PB: predicated region body
PF: predicated region fallthrough
CT: control target
= control target key end

     0   :  { %s1811_s12 = smov 0   ;;  %s2190_s0 = inlined_call_operand.vmem [shape: bf16[2,16,64], index: 0, kind: input, shape index: {}]   ;;  %s2191_s1 = inlined_call_operand.vmem [shape: bf16[3,64,896], index: 1, kind: input, shape index: {}]   ;;  %s2192_s2 = inlined_call_operand.vmem [shape: f32[1,896], index: 2, kind: input, shape index: {}]   ;;  %s2193_s3 = inlined_call_operand.vmem [shape: bf16[2,14,896], index: 3, kind: output, shape index: {}]  }
   0x1 LB: > { %s1408_s13 = sadd.s32 4294967295, %s1786_s12   ;;  %p1412_p0 = scmp.ge.s32.totalorder %s1786_s12, 1  ;;  %s1786_s12 = sphi %s1811_s12, %s13_s12  }
   0x2   : > { %p137_p1 = scmp.lt.s32.totalorder %s1786_s12, 3 }
   0x4   : > { %p138_p2 = pnand %p1412_p0, %p137_p1 }
   0x5   : > { %p161_p3 = scmp.lt.s32.totalorder (!%p138_p2), %s1408_s13, 1 }
   0x6   : > { %141 = sbr.rel (%p138_p2) target bundleno = 315 (0x13b), region = 32 }
   0xb   : > { %v1659_v0 = vld [vmem:[%s2191_s1 + $0x18c] ss:$28 sps:$4 sm:$0xff]   ;;  %v1661_v1 = vld [vmem:[%s2191_s1 + $0x194] ss:$28 sps:$4 sm:$0xff]   ;;  %v1788_v2 = vmov 0   ;;  %s2195_s13 = smov (!%p161_p3, %s1408_s13), 1 }
   0xc   : > { %465 = vmatprep.mubr.bf16.mxu0 %v1788_v2  ;;  %508 = vmatprep.mubr.bf16.mxu1 %v1788_v2  ;;  %v1663_v3 = vld [vmem:[%s2191_s1 + $0x188] ss:$28 sps:$4 sm:$0xff]   ;;  %v1664_v4 = vld [vmem:[%s2191_s1 + $0x190] ss:$28 sps:$4 sm:$0xff]   ;;  %v1667_v6 = vld [vmem:[%s2191_s1 + $0x15c] ss:$28 sps:$4 sm:$0xff]  }
   0xd   : > { %441 = vmatprep.subr.bf16.mxu0 %v1659_v0  ;;  %484 = vmatprep.subr.bf16.mxu1 %v1661_v1  ;;  %v1665_v5 = vld [vmem:[%s2191_s1 + $0x154] ss:$28 sps:$4 sm:$0xff]   ;;  %s1587_s30 = sshll.u32 %s2195_s13, 3  ;;  %v1671_v9 = vld [vmem:[%s2191_s1 + $0x11c] ss:$28 sps:$4 sm:$0xff]   ;;  %vm429_vm0 = vcmask 523264  }
   0xe   : > { %442 = vmatpush1.bf16.msra.mxu0 %v1663_v3  ;;  %485 = vmatpush1.bf16.msra.mxu1 %v1664_v4  ;;  %v1669_v7 = vld [vmem:[%s2191_s1 + $0x150] ss:$28 sps:$4 sm:$0xff]   ;;  %v1670_v8 = vld [vmem:[%s2191_s1 + $0x158] ss:$28 sps:$4 sm:$0xff]   ;;  %v1673_v10 = vld [vmem:[%s2191_s1 + $0x124] ss:$28 sps:$4 sm:$0xff]   ;;  %s165_s18 = scalar_lea.vmem %s2190_s0, %s1587_s30 }
   0xf   : > { %443 = vmatprep.subr.bf16.mxu0 %v1665_v5  ;;  %486 = vmatprep.subr.bf16.mxu1 %v1667_v6  ;;  %v1675_v11 = vld [vmem:[%s2191_s1 + $0x118] ss:$28 sps:$4 sm:$0xff]   ;;  %v1676_v12 = vld [vmem:[%s2191_s1 + $0x120] ss:$28 sps:$4 sm:$0xff]   ;;  %v1679_v14 = vld [vmem:[%s2191_s1 + $0xec] ss:$28 sps:$4 sm:$0xff]  }
  0x10   : > { %v1677_v13 = vld [vmem:[%s2191_s1 + $0xe4] ss:$28 sps:$4 sm:$0xff]   ;;  %v1686_v18 = vld [vmem:[%s2191_s1 + $0x19c] ss:$28 sps:$4 sm:$0xff]   ;;  %v1789_v25 = vmov 0.0   ;;  %vm1790_vm1 = vmmov 0  }
  0x11   : > { %v1681_v15 = vld [vmem:[%s2191_s1 + $0xe0] ss:$28 sps:$4 sm:$0xff]   ;;  %v1682_v17 = vld [vmem:[%s2191_s1 + $0xe8] ss:$28 sps:$4 sm:$0xff]   ;;  %v1684_v22 = vld [vmem:[%s2191_s1 + $0x198] ss:$28 sps:$4 sm:$0xff]  }
  0x12   : > { %444 = vmatpush1.bf16.msra.mxu0 %v1669_v7  ;;  %487 = vmatpush1.bf16.msra.mxu1 %v1670_v8  ;;  %v1872_v16 = vld [vmem:[%s165_s18] sm:$0xff]   ;;  %v1694_v29 = vld [vmem:[%s2191_s1 + $0x12c] ss:$28 sps:$4 sm:$0xff]   ;;  %v1698_v32 = vld [vmem:[%s2191_s1 + $0xf4] ss:$28 sps:$4 sm:$0xff]   ;;  %s1647_s11 = smul.u32 56, %s2195_s13 }
  0x13   : > { %445 = vmatprep.subr.bf16.mxu0 %v1671_v9  ;;  %488 = vmatprep.subr.bf16.mxu1 %v1673_v10  ;;  %v279_v19 = vshrl.u32 %v1872_v16, 16  ;;  %v281_v20 = vshll.u32 %v1872_v16, 16  ;;  %v1687_v23 = vld [vmem:[%s2191_s1 + $0x1a0] ss:$28 sps:$4 sm:$0xff]   ;;  %v1691_v28 = vld [vmem:[%s2191_s1 + $0x168] ss:$28 sps:$4 sm:$0xff]  }
  0x14   : > { %v1690_v26 = vld [vmem:[%s2191_s1 + $0x164] ss:$28 sps:$4 sm:$0xff]   ;;  %v1695_v31 = vld [vmem:[%s2191_s1 + $0x130] ss:$28 sps:$4 sm:$0xff]   ;;  %v1699_v34 = vld [vmem:[%s2191_s1 + $0xf8] ss:$28 sps:$4 sm:$0xff]   ;;  %s2162_s16 = scalar_lea.vmem %s2193_s3, %s1647_s11 }
  0x15   : > { %v283_v21 = vrot.slane %v281_v20, 1  ;;  %v1688_v27 = vld [vmem:[%s2191_s1 + $0x160] ss:$28 sps:$4 sm:$0xff]   ;;  %v1692_v30 = vld [vmem:[%s2191_s1 + $0x128] ss:$28 sps:$4 sm:$0xff]  }
  0x16   : > { %446 = vmatpush1.bf16.msra.mxu0 %v1675_v11  ;;  %489 = vmatpush1.bf16.msra.mxu1 %v1676_v12  ;;  %v1696_v33 = vld [vmem:[%s2191_s1 + $0xf0] ss:$28 sps:$4 sm:$0xff]   ;;  %v1700_v37 = vld [vmem:[%s2191_s1 + $0xa8] ss:$28 sps:$4 sm:$0xff]   ;;  %v1711_v40 = vld [vmem:[%s2191_s1 + $0x7c] ss:$28 sps:$4 sm:$0xff]  }
  0x17   : > { %447 = vmatprep.subr.bf16.mxu0 %v1677_v13  ;;  %490 = vmatprep.subr.bf16.mxu1 %v1679_v14  ;;  %v284_v24 = vor.u32 %v283_v21, %v279_v19  ;;  %v1702_v35 = vld [vmem:[%s2191_s1 + $0xac] ss:$28 sps:$4 sm:$0xff]   ;;  %v1705_v36 = vld [vmem:[%s2191_s1 + $0xb4] ss:$28 sps:$4 sm:$0xff]   ;;  %v1714_v43 = vld [vmem:[%s2191_s1 + $0x3c] ss:$28 sps:$4 sm:$0xff]  }
  0x18   : > { %v1703_v38 = vld [vmem:[%s2191_s1 + $0xb0] ss:$28 sps:$4 sm:$0xff]   ;;  %v1709_v42 = vld [vmem:[%s2191_s1 + $0x78] ss:$28 sps:$4 sm:$0xff]   ;;  %v1717_v44 = vld [vmem:[%s2191_s1 + $0x44] ss:$28 sps:$4 sm:$0xff]  }
  0x19   : > { %v1708_v39 = vld [vmem:[%s2191_s1 + $0x74] ss:$28 sps:$4 sm:$0xff]   ;;  %v1715_v46 = vld [vmem:[%s2191_s1 + $0x40] ss:$28 sps:$4 sm:$0xff]   ;;  %v1723_v48 = vld [vmem:[%s2191_s1 + $0xc] ss:$28 sps:$4 sm:$0xff]  }
  0x1a   : > { %448 = vmatpush1.bf16.msra.mxu0 %v1681_v15  ;;  %491 = vmatpush1.bf16.msra.mxu1 %v1682_v17  ;;  %v1706_v41 = vld [vmem:[%s2191_s1 + $0x70] ss:$28 sps:$4 sm:$0xff]   ;;  %v1712_v45 = vld [vmem:[%s2191_s1 + $0x38] ss:$28 sps:$4 sm:$0xff]   ;;  %v1720_v47 = vld [vmem:[%s2191_s1 + $0x4] ss:$28 sps:$4 sm:$0xff]  }
  0x1b   : > { %527 = vmatprep.subr.bf16.mxu0 %v1686_v18  ;;  %1611 = vmatprep.subr.bf16.mxu1 %v1789_v25  ;;  %v1718_v49 = vld [vmem:[%s2191_s1] ss:$28 sps:$4 sm:$0xff]   ;;  %v1721_v50 = vld [vmem:[%s2191_s1 + $0x8] ss:$28 sps:$4 sm:$0xff]   ;;  %v1724_v52 = vld [vmem:[%s2191_s1 + $0xb8] ss:$28 sps:$4 sm:$0xff]  }
  0x1c   : > { %v1726_v51 = vld [vmem:[%s2191_s1 + $0xbc] ss:$28 sps:$4 sm:$0xff]   ;;  %v1730_v54 = vld [vmem:[%s2191_s1 + $0x84] ss:$28 sps:$4 sm:$0xff]   ;;  %v1734_v57 = vld [vmem:[%s2191_s1 + $0x4c] ss:$28 sps:$4 sm:$0xff]  }
  0x1d   : > { %1509 = vmatmul.mubr.msk.bf16.vlgmr.msra.gmra.mxu0 %vm429_vm0, %v284_v24  ;;  %1510 = vmatmul.mubr.msk.bf16.vlgmr.msra.gmra.mxu1 %vm429_vm0, %v284_v24  ;;  %v1727_v53 = vld [vmem:[%s2191_s1 + $0xc0] ss:$28 sps:$4 sm:$0xff]   ;;  %v1731_v56 = vld [vmem:[%s2191_s1 + $0x88] ss:$28 sps:$4 sm:$0xff]   ;;  %v1735_v59 = vld [vmem:[%s2191_s1 + $0x50] ss:$28 sps:$4 sm:$0xff]  }
  0x1e   : > { %528 = vmatpush1.bf16.msra.mxu0 %v1684_v22  ;;  %1612 = vmatpush3.bf16.msra.mxu1 %v1687_v23  ;;  %v1728_v55 = vld [vmem:[%s2191_s1 + $0x80] ss:$28 sps:$4 sm:$0xff]   ;;  %v1732_v58 = vld [vmem:[%s2191_s1 + $0x48] ss:$28 sps:$4 sm:$0xff]   ;;  %v1738_v60 = vld [vmem:[%s2191_s1 + $0x14] ss:$28 sps:$4 sm:$0xff]  }
  0x1f   : > { %529 = vmatprep.subr.bf16.mxu0 %v1690_v26  ;;  %1613 = vmatprep.subr.bf16.mxu1 %v1789_v25  ;;  %v1736_v61 = vld [vmem:[%s2191_s1 + $0x10] ss:$28 sps:$4 sm:$0xff]   ;;  %v1739_v62 = vld [vmem:[%s2191_s1 + $0x18] ss:$28 sps:$4 sm:$0xff]   ;;  %v1740_v1 = vld [vmem:[%s2191_s1 + $0x268] ss:$28 sps:$4 sm:$0xff]  }
  0x20   : > { %551 = vmatprep.mubr.bf16.mxu0 %v1788_v2  ;;  %1619 = vmatprep.mubr.msk.bf16.mxu1 %vm1790_vm1, %v1789_v25  ;;  %v1742_v63 = vld [vmem:[%s2191_s1 + $0x26c] ss:$28 sps:$4 sm:$0xff]   ;;  %v1745_v0 = vld [vmem:[%s2191_s1 + $0x274] ss:$28 sps:$4 sm:$0xff]   ;;  %v1751_v5 = vld [vmem:[%s2191_s1 + $0x23c] ss:$28 sps:$4 sm:$0xff]  }
  0x21   : > { %v1743_v3 = vld [vmem:[%s2191_s1 + $0x270] ss:$28 sps:$4 sm:$0xff]   ;;  %v1749_v7 = vld [vmem:[%s2191_s1 + $0x238] ss:$28 sps:$4 sm:$0xff]   ;;  %v1757_v9 = vld [vmem:[%s2191_s1 + $0x204] ss:$28 sps:$4 sm:$0xff]  }
  0x22   : > { %530 = vmatpush1.bf16.msra.mxu0 %v1688_v27  ;;  %1614 = vmatpush3.bf16.msra.mxu1 %v1691_v28  ;;  %v1748_v4 = vld [vmem:[%s2191_s1 + $0x234] ss:$28 sps:$4 sm:$0xff]   ;;  %v1754_v8 = vld [vmem:[%s2191_s1 + $0x1fc] ss:$28 sps:$4 sm:$0xff]   ;;  %v1760_v12 = vld [vmem:[%s2191_s1 + $0x1c4] ss:$28 sps:$4 sm:$0xff]  }
  0x23   : > { %531 = vmatprep.subr.bf16.mxu0 %v1694_v29  ;;  %1615 = vmatprep.subr.bf16.mxu1 %v1789_v25  ;;  %v1746_v6 = vld [vmem:[%s2191_s1 + $0x230] ss:$28 sps:$4 sm:$0xff]   ;;  %v1752_v10 = vld [vmem:[%s2191_s1 + $0x1f8] ss:$28 sps:$4 sm:$0xff]   ;;  %v1755_v11 = vld [vmem:[%s2191_s1 + $0x200] ss:$28 sps:$4 sm:$0xff]  }
  0x24   : > { %v1763_v13 = vld [vmem:[%s2191_s1 + $0x1cc] ss:$28 sps:$4 sm:$0xff]   ;;  %v1758_v14 = vld [vmem:[%s2191_s1 + $0x1c0] ss:$28 sps:$4 sm:$0xff]   ;;  %v919_v18 = vrot.slane %v1872_v16, 1 }
  0x25   : > { %v1761_v15 = vld [vmem:[%s2191_s1 + $0x1c8] ss:$28 sps:$4 sm:$0xff]   ;;  %v1766_v17 = vld [vmem:[%s2191_s1 + $0x27c] ss:$28 sps:$4 sm:$0xff]   ;;  %v1775_v26 = vld [vmem:[%s2191_s1 + $0x210] ss:$28 sps:$4 sm:$0xff]  }
  0x26   : > { %532 = vmatpush1.bf16.msra.mxu0 %v1692_v30  ;;  %1616 = vmatpush3.bf16.msra.mxu1 %v1695_v31  ;;  %v1764_v19 = vld [vmem:[%s2191_s1 + $0x278] ss:$28 sps:$4 sm:$0xff]   ;;  %v1767_v20 = vld [vmem:[%s2191_s1 + $0x280] ss:$28 sps:$4 sm:$0xff]   ;;  %v1771_v22 = vld [vmem:[%s2191_s1 + $0x248] ss:$28 sps:$4 sm:$0xff]  }
  0x27   : > { %533 = vmatprep.subr.bf16.mxu0 %v1698_v32  ;;  %1617 = vmatprep.subr.bf16.mxu1 %v1789_v25  ;;  %v1770_v21 = vld [vmem:[%s2191_s1 + $0x244] ss:$28 sps:$4 sm:$0xff]   ;;  %v1774_v23 = vld [vmem:[%s2191_s1 + $0x20c] ss:$28 sps:$4 sm:$0xff]   ;;  %v1779_v28 = vld [vmem:[%s2191_s1 + $0x1d8] ss:$28 sps:$4 sm:$0xff]  }
  0x28   : > { %v1776_v27 = vld [vmem:[%s2191_s1 + $0x1d0] ss:$28 sps:$4 sm:$0xff]  }
  0x2a   : > { %534 = vmatpush1.bf16.msra.mxu0 %v1696_v33  ;;  %1618 = vmatpush3.bf16.msra.mxu1 %v1699_v34 }
  0x2b   : > { %757 = vmatprep.subr.bf16.mxu0 %v1702_v35  ;;  %800 = vmatprep.subr.bf16.mxu1 %v1705_v36 }
  0x2d   : > { %1511 = vmatmul.mubr.msk.bf16.vlgmr.msra.gmra.mxu0 %vm429_vm0, %v284_v24  ;;  %1620 = vmatmul.mubr.msk.bf16.vlgmr.msra.gmra.mxu1 %vm429_vm0, %v284_v24  ;;  %v1772_v24 = vld [vmem:[%s2191_s1 + $0x208] ss:$28 sps:$4 sm:$0xff]  }
  0x2e   : > { %758 = vmatpush1.bf16.msra.mxu0 %v1700_v37  ;;  %801 = vmatpush1.bf16.msra.mxu1 %v1703_v38 }
  0x2f   : > { %759 = vmatprep.subr.bf16.mxu0 %v1708_v39  ;;  %802 = vmatprep.subr.bf16.mxu1 %v1711_v40 }
  0x30   : > { %781 = vmatprep.mubr.bf16.mxu0 %v1788_v2  ;;  %824 = vmatprep.mubr.bf16.mxu1 %v1788_v2 }
  0x32   : > { %760 = vmatpush1.bf16.msra.mxu0 %v1706_v41  ;;  %803 = vmatpush1.bf16.msra.mxu1 %v1709_v42 }
  0x33   : > { %761 = vmatprep.subr.bf16.mxu0 %v1714_v43  ;;  %804 = vmatprep.subr.bf16.mxu1 %v1717_v44 }
  0x36   : > { %762 = vmatpush1.bf16.msra.mxu0 %v1712_v45  ;;  %805 = vmatpush1.bf16.msra.mxu1 %v1715_v46 }
  0x37   : > { %763 = vmatprep.subr.bf16.mxu0 %v1720_v47  ;;  %806 = vmatprep.subr.bf16.mxu1 %v1723_v48 }
  0x3a   : > { %764 = vmatpush1.bf16.msra.mxu0 %v1718_v49  ;;  %807 = vmatpush1.bf16.msra.mxu1 %v1721_v50 }
  0x3b   : > { %843 = vmatprep.subr.bf16.mxu0 %v1726_v51  ;;  %1623 = vmatprep.subr.bf16.mxu1 %v1789_v25 }
  0x3d   : > { %1541 = vmatmul.mubr.msk.bf16.vlgmr.msra.gmra.mxu0 %vm429_vm0, %v1872_v16  ;;  %1542 = vmatmul.mubr.msk.bf16.vlgmr.msra.gmra.mxu1 %vm429_vm0, %v1872_v16 }
  0x3e   : > { %844 = vmatpush1.bf16.msra.mxu0 %v1724_v52  ;;  %1624 = vmatpush3.bf16.msra.mxu1 %v1727_v53 }
  0x3f   : > { %845 = vmatprep.subr.bf16.mxu0 %v1730_v54  ;;  %1625 = vmatprep.subr.bf16.mxu1 %v1789_v25 }
  0x40   : > { %867 = vmatprep.mubr.bf16.mxu0 %v1788_v2  ;;  %1631 = vmatprep.mubr.msk.bf16.mxu1 %vm1790_vm1, %v1789_v25 }
  0x42   : > { %846 = vmatpush1.bf16.msra.mxu0 %v1728_v55  ;;  %1626 = vmatpush3.bf16.msra.mxu1 %v1731_v56  ;;  %v1252_v56 = vlaneseq }
  0x43   : > { %847 = vmatprep.subr.bf16.mxu0 %v1734_v57  ;;  %1627 = vmatprep.subr.bf16.mxu1 %v1789_v25 }
  0x46   : > { %848 = vmatpush1.bf16.msra.mxu0 %v1732_v58  ;;  %1628 = vmatpush3.bf16.msra.mxu1 %v1735_v59  ;;  %v2145_v59 = vshrl.u32 %v1252_v56, 7 }
  0x47   : > { %849 = vmatprep.subr.bf16.mxu0 %v1738_v60  ;;  %1629 = vmatprep.subr.bf16.mxu1 %v1789_v25 }
  0x4a   : > { %850 = vmatpush1.bf16.msra.mxu0 %v1736_v61  ;;  %1630 = vmatpush3.bf16.msra.mxu1 %v1739_v62  ;;  %v1254_v61 = vsub.s32 0, %v2145_v59  ;;  %v1262_v62 = vsub.s32 2, %v2145_v59 }
  0x4b   : > { %1075 = vmatprep.subr.bf16.mxu0 %v1742_v63  ;;  %1118 = vmatprep.subr.bf16.mxu1 %v1745_v0  ;;  %v1258_v63 = vsub.s32 1, %v2145_v59  ;;  %v1266_v0 = vsub.s32 3, %v2145_v59 }
  0x4d   : > { %1543 = vmatmul.mubr.msk.bf16.vlgmr.msra.gmra.mxu0 %vm429_vm0, %v1872_v16  ;;  %1632 = vmatmul.mubr.msk.bf16.vlgmr.msra.gmra.mxu1 %vm429_vm0, %v1872_v16  ;;  %v1768_v16 = vld [vmem:[%s2191_s1 + $0x240] ss:$28 sps:$4 sm:$0xff]  }
  0x4e   : > { %1076 = vmatpush1.bf16.msra.mxu0 %v1740_v1  ;;  %1119 = vmatpush1.bf16.msra.mxu1 %v1743_v3  ;;  %v172_v1 = vld [vmem:[%s2192_s2] sm:$0xff] }
  0x4f   : > { %1077 = vmatprep.subr.bf16.mxu0 %v1748_v4  ;;  %1120 = vmatprep.subr.bf16.mxu1 %v1751_v5 }
  0x50   : > { %1099 = vmatprep.mubr.bf16.mxu0 %v1788_v2  ;;  %1142 = vmatprep.mubr.bf16.mxu1 %v1788_v2 }
  0x52   : > { %1078 = vmatpush1.bf16.msra.mxu0 %v1746_v6  ;;  %1121 = vmatpush1.bf16.msra.mxu1 %v1749_v7  ;;  %v1255_v7 = vrot.slane %v172_v1, %v1254_v61 }
  0x53   : > { %1079 = vmatprep.subr.bf16.mxu0 %v1754_v8  ;;  %1122 = vmatprep.subr.bf16.mxu1 %v1757_v9  ;;  %v1263_v9 = vrot.slane %v172_v1, %v1262_v62 }
  0x56   : > { %1080 = vmatpush1.bf16.msra.mxu0 %v1752_v10  ;;  %1123 = vmatpush1.bf16.msra.mxu1 %v1755_v11  ;;  %v1259_v10 = vrot.slane %v172_v1, %v1258_v63  ;;  %v1267_v11 = vrot.slane %v172_v1, %v1266_v0 }
  0x57   : > { %1081 = vmatprep.subr.bf16.mxu0 %v1760_v12  ;;  %1124 = vmatprep.subr.bf16.mxu1 %v1763_v13 }
  0x5a   : > { %1082 = vmatpush1.bf16.msra.mxu0 %v1758_v14  ;;  %1125 = vmatpush1.bf16.msra.mxu1 %v1761_v15 }
  0x5b   : > { %1161 = vmatprep.subr.bf16.mxu0 %v1766_v17  ;;  %1635 = vmatprep.subr.bf16.mxu1 %v1789_v25 }
  0x5d   : > { %1573 = vmatmul.mubr.msk.bf16.vlgmr.msra.gmra.mxu0 %vm429_vm0, %v919_v18  ;;  %1574 = vmatmul.mubr.msk.bf16.vlgmr.msra.gmra.mxu1 %vm429_vm0, %v919_v18 }
  0x5e   : > { %1162 = vmatpush1.bf16.msra.mxu0 %v1764_v19  ;;  %1636 = vmatpush3.bf16.msra.mxu1 %v1767_v20 }
  0x5f   : > { %1163 = vmatprep.subr.bf16.mxu0 %v1770_v21  ;;  %1637 = vmatprep.subr.bf16.mxu1 %v1789_v25 }
  0x60   : > { %1185 = vmatprep.mubr.bf16.mxu0 %v1788_v2  ;;  %1643 = vmatprep.mubr.msk.bf16.mxu1 %vm1790_vm1, %v1789_v25  ;;  %v1778_v2 = vld [vmem:[%s2191_s1 + $0x1d4] ss:$28 sps:$4 sm:$0xff]  }
  0x62   : > { %1164 = vmatpush1.bf16.msra.mxu0 %v1768_v16  ;;  %1638 = vmatpush3.bf16.msra.mxu1 %v1771_v22 }
  0x63   : > { %1165 = vmatprep.subr.bf16.mxu0 %v1774_v23  ;;  %1639 = vmatprep.subr.bf16.mxu1 %v1789_v25 }
  0x66   : > { %1166 = vmatpush1.bf16.msra.mxu0 %v1772_v24  ;;  %1640 = vmatpush3.bf16.msra.mxu1 %v1775_v26 }
  0x67   : > { %1167 = vmatprep.subr.bf16.mxu0 %v1778_v2  ;;  %1641 = vmatprep.subr.bf16.mxu1 %v1789_v25 }
  0x6a   : > { %1168 = vmatpush1.bf16.msra.mxu0 %v1776_v27  ;;  %1642 = vmatpush3.bf16.msra.mxu1 %v1779_v28 }
  0x6d   : > { %1575 = vmatmul.mubr.msk.bf16.vlgmr.msra.gmra.mxu0 %vm429_vm0, %v919_v18  ;;  %1644 = vmatmul.mubr.msk.bf16.vlgmr.msra.gmra.mxu1 %vm429_vm0, %v919_v18 }
  0xdd   : > { %v510_v29 = vpop.f32.mrf.mxu1  ;;  %v467_v31 = vpop.f32.mrf.mxu0 }
  0xdf   : > { %v512_v30 = vpop.f32.mrf.mxu1  ;;  %v469_v33 = vpop.f32.mrf.mxu0 }
  0xe1   : > { %v514_v32 = vpop.f32.mrf.mxu1  ;;  %v471_v35 = vpop.f32.mrf.mxu0 }
  0xe3   : > { %v516_v34 = vpop.f32.mrf.mxu1  ;;  %v473_v38 = vpop.f32.mrf.mxu0 }
  0xed   : > { %v2125_v36 = vpop.f32.mrf.mxu1  ;;  %v2129_v25 = vpop.f32.mrf.mxu0 }
  0xef   : > { %v1621_v37 = vpop.f32.mrf.mxu1  ;;  %v2131_v41 = vpop.f32.mrf.mxu0 }
  0xf1   : > { %v2127_v39 = vpop.f32.mrf.mxu1  ;;  %v2133_v42 = vpop.f32.mrf.mxu0 }
  0xf3   : > { %v1622_v40 = vpop.f32.mrf.mxu1  ;;  %v2135_v43 = vpop.f32.mrf.mxu0 }
  0xfd   : > { %v826_v44 = vpop.f32.mrf.mxu1  ;;  %v783_v45 = vpop.f32.mrf.mxu0 }
  0xfe   : > { %v784_v4 = vadd.f32 %v783_v45, %v467_v31  ;;  %v827_v5 = vadd.f32 %v826_v44, %v510_v29 }
  0xff   : > { %v828_v46 = vpop.f32.mrf.mxu1  ;;  %v785_v47 = vpop.f32.mrf.mxu0 }
 0x100   : > { %v786_v12 = vadd.f32 %v785_v47, %v469_v33  ;;  %v829_v13 = vadd.f32 %v828_v46, %v512_v30  ;;  %v1278_v47 = vsub.s32 6, %v2145_v59 }
 0x101   : > { %v830_v48 = vpop.f32.mrf.mxu1  ;;  %v787_v49 = vpop.f32.mrf.mxu0 }
 0x102   : > { %v788_v21 = vadd.f32 %v787_v49, %v471_v35  ;;  %v831_v16 = vadd.f32 %v830_v48, %v514_v32 }
 0x103   : > { %v832_v50 = vpop.f32.mrf.mxu1  ;;  %v789_v51 = vpop.f32.mrf.mxu0 }
 0x104   : > { %v790_v28 = vadd.f32 %v789_v51, %v473_v38  ;;  %v833_v29 = vadd.f32 %v832_v50, %v516_v34  ;;  %v1270_v50 = vsub.s32 4, %v2145_v59  ;;  %v1274_v51 = vsub.s32 5, %v2145_v59 }
 0x106   : > { %v1271_v62 = vrot.slane %v172_v1, %v1270_v50 }
 0x10d   : > { %v2137_v52 = vpop.f32.mrf.mxu1  ;;  %v2139_v53 = vpop.f32.mrf.mxu0 }
 0x10e   : > { %v913_v56 = vadd.f32 %v2137_v52, %v2125_v36 }
 0x10f   : > { %v1633_v54 = vpop.f32.mrf.mxu1  ;;  %v2143_v57 = vpop.f32.mrf.mxu0 }
 0x110   : > { %v870_v54 = vadd.f32 %v2139_v53, %v2129_v25  ;;  %v872_v0 = vadd.f32 %v2143_v57, %v2131_v41 }
 0x111   : > { %v2141_v55 = vpop.f32.mrf.mxu1  ;;  %v2147_v60 = vpop.f32.mrf.mxu0 }
 0x112   : > { %v916_v25 = vadd.f32 %v2141_v55, %v2127_v39 }
 0x113   : > { %v1634_v58 = vpop.f32.mrf.mxu1  ;;  %v2156_v3 = vpop.f32.mrf.mxu0 }
 0x114   : > { %v1279_v58 = vrot.slane %v172_v1, %v1278_v47  ;;  %v876_v53 = vadd.f32 %v2156_v3, %v2135_v43 }
 0x11d   : > { %v1101_v6 = vpop.f32.mrf.mxu0  ;;  %v1144_v8 = vpop.f32.mrf.mxu1 }
 0x11e   : > { %v1237_v14 = vadd.f32 %v1101_v6, %v784_v4  ;;  %v1239_v15 = vadd.f32 %v1144_v8, %v827_v5  ;;  %v1275_v6 = vrot.slane %v172_v1, %v1274_v51  ;;  %v874_v8 = vadd.f32 %v2147_v60, %v2133_v42 }
 0x11f   : > { %v1103_v17 = vpop.f32.mrf.mxu0  ;;  %v1146_v18 = vpop.f32.mrf.mxu1 }
 0x120   : > { %v1238_v19 = vadd.f32 %v1103_v17, %v786_v12  ;;  %v1240_v20 = vadd.f32 %v1146_v18, %v829_v13  ;;  %v1287_v24 = vadd.f32 %v1255_v7, %v1237_v14  ;;  %v1289_v26 = vadd.f32 %v1263_v9, %v1239_v15 }
 0x121   : > { %v1105_v22 = vpop.f32.mrf.mxu0  ;;  %v1148_v23 = vpop.f32.mrf.mxu1 }
 0x122   : > { %v1288_v2 = vadd.f32 %v1259_v10, %v1238_v19  ;;  %v1290_v27 = vadd.f32 %v1267_v11, %v1240_v20  ;;  %v1244_v30 = vadd.f32 %v1105_v22, %v788_v21  ;;  %v1246_v31 = vadd.f32 %v1148_v23, %v831_v16 }
 0x123   : > { %v1107_v33 = vpop.f32.mrf.mxu0  ;;  %v1150_v35 = vpop.f32.mrf.mxu1 }
 0x124   : > { %v1588_v32 = vpack.c.bf16 %v1288_v2, %v1287_v24  ;;  %v1589_v37 = vpack.c.bf16 %v1290_v27, %v1289_v26  ;;  %v1245_v40 = vadd.f32 %v1107_v33, %v790_v28  ;;  %v1247_v44 = vadd.f32 %v1150_v35, %v833_v29 }
 0x125   : > { %v1294_v34 = vadd.f32 %v1255_v7, %v1244_v30  ;;  %v1296_v38 = vadd.f32 %v1263_v9, %v1246_v31 }
 0x126   : > { %1345 = vst [vmem:[%s2162_s16] sm:$0xff] %v1588_v32  ;;  %1346 = vst [vmem:[%s2162_s16 + $0x8] sm:$0xff] %v1589_v37  ;;  %v1295_v45 = vadd.f32 %v1259_v10, %v1245_v40  ;;  %v1297_v46 = vadd.f32 %v1267_v11, %v1247_v44 }
 0x128   : > { %v1592_v48 = vpack.c.bf16 %v1295_v45, %v1294_v34  ;;  %v1593_v49 = vpack.c.bf16 %v1297_v46, %v1296_v38 }
 0x12a   : > { %1349 = vst [vmem:[%s2162_s16 + $0x1c] sm:$0x77] %v1592_v48  ;;  %1350 = vst [vmem:[%s2162_s16 + $0x24] sm:$0x77] %v1593_v49 }
 0x12d   : > { %v1187_v61 = vpop.f32.mrf.mxu0  ;;  %v1230_v63 = vpop.f32.mrf.mxu1 }
 0x12e   : > { %v1241_v4 = vadd.f32 %v1187_v61, %v870_v54  ;;  %v1243_v5 = vadd.f32 %v1230_v63, %v913_v56 }
 0x12f   : > { %v1189_v7 = vpop.f32.mrf.mxu0  ;;  %v1645_v59 = vpop.f32.mrf.mxu1 }
 0x130   : > { %v1293_v36 = vadd.f32 %v1279_v58, %v1243_v5  ;;  %v1242_v52 = vadd.f32 %v1189_v7, %v872_v0  ;;  %v1291_v9 = vadd.f32 %v1271_v62, %v1241_v4 }
 0x131   : > { %v1191_v41 = vpop.f32.mrf.mxu0  ;;  %v1233_v57 = vpop.f32.mrf.mxu1 }
 0x132   : > { %v1591_v1 = vpack.c.bf16 %v1293_v36, %v1293_v36  ;;  %v1292_v10 = vadd.f32 %v1275_v6, %v1242_v52  ;;  %v1248_v11 = vadd.f32 %v1191_v41, %v874_v8  ;;  %v1250_v12 = vadd.f32 %v1233_v57, %v916_v25 }
 0x133   : > { %v1193_v13 = vpop.f32.mrf.mxu0  ;;  %v1646_v42 = vpop.f32.mrf.mxu1 }
 0x134   : > { %1348 = vst [vmem:[%s2162_s16 + $0x18] sm:$0xf] %v1591_v1  ;;  %v1590_v60 = vpack.c.bf16 %v1292_v10, %v1291_v9  ;;  %v1300_v39 = vadd.f32 %v1279_v58, %v1250_v12  ;;  %v1249_v55 = vadd.f32 %v1193_v13, %v876_v53  ;;  %v1298_v14 = vadd.f32 %v1271_v62, %v1248_v11 }
 0x136   : > { %1347 = vst [vmem:[%s2162_s16 + $0x10] sm:$0xff] %v1590_v60  ;;  %v1595_v15 = vpack.c.bf16 %v1300_v39, %v1300_v39  ;;  %v1299_v17 = vadd.f32 %v1275_v6, %v1249_v55 }
 0x138   : > { %1352 = vst [vmem:[%s2162_s16 + $0x34] sm:$0x7] %v1595_v15  ;;  %v1594_v43 = vpack.c.bf16 %v1299_v17, %v1298_v14 }
 0x13a   : > { %1351 = vst [vmem:[%s2162_s16 + $0x2c] sm:$0x77] %v1594_v43 }
 0x13b PF: > { %s13_s12 = sadd.s32 1, %s1786_s12  }
 0x13c   : > { %p10_p4 = scmp.ge.s32.totalorder %s13_s12, 4  }
 0x13e   :  { %12 = sbr.rel (!%p10_p4) target bundleno = 1 (0x1), region = 64 }

</bundles_post_ra>
